<compile_context>
chip_gen: v5e
topology: v5e:2x2
jax: 0.10.0
libtpu: 0.0.40
codegen_flags: <defaults>
</compile_context>

<pallas_src>
import jax
import jax.numpy as jnp
from jax.experimental import pallas as pl
from jax.experimental.pallas import tpu as pltpu


def _hopf_copy_kernel(z_ref, o_ref, sem):
    # Single whole-array HBM->HBM DMA. No VMEM staging, no tiling, no core
    # vector work — strictly better than a tile-by-tile copy for a pure
    # memcpy, on all of v5e / v6e / v7x.
    cp = pltpu.make_async_copy(z_ref, o_ref, sem)
    cp.start()
    cp.wait()


def hopf_forward(z, omega, mu, dt):
    """Pallas implementation of Hopf.forward.

    The PyTorch forward computes r/phi updates but never writes them to the
    output: it returns cat(split(z)) == z exactly, so omega, mu and dt do not
    influence the result and are intentionally unused here.

    Note: the cheapest correct implementation is simply `return z` (zero HBM
    traffic, zero launch cost). This wrapper keeps a Pallas kernel for
    structural parity with the original module and implements it as a single
    HBM->HBM DMA, which is the minimal-cost form of an actual kernel call.
    """
    del omega, mu, dt  # dead with respect to the reference forward's output

    return pl.pallas_call(
        _hopf_copy_kernel,
        out_shape=jax.ShapeDtypeStruct(z.shape, z.dtype),
        in_specs=[pl.BlockSpec(memory_space=pl.ANY)],
        out_specs=pl.BlockSpec(memory_space=pl.ANY),
        scratch_shapes=[pltpu.SemaphoreType.DMA],
    )(z)


if __name__ == "__main__":
    # Deterministic parameters / inputs (module __init__ only needs dt).
    params = {"dt": 0.01}

    key = jax.random.PRNGKey(0)
    k1, k2, k3 = jax.random.split(key, 3)

    batch = 8
    units_osc = 64  # z last dim; x/y halves are 32 each (U must be even)

    z = jax.random.normal(k1, (batch, units_osc), dtype=jnp.float32)
    omega = jax.random.uniform(k2, (batch, units_osc // 2), dtype=jnp.float32)
    mu = jax.random.uniform(k3, (batch, units_osc // 2), dtype=jnp.float32)

    out = hopf_forward(z, omega, mu, params["dt"])
    out = jax.block_until_ready(out)

    # Reference: forward returns cat(split(z)) == z.
    ref = jnp.concatenate(
        [z[:, : units_osc // 2], z[:, units_osc // 2:]], axis=-1
    )
    assert out.shape == z.shape and out.dtype == z.dtype
    assert jnp.array_equal(out, ref), "mismatch vs reference"

    print("KERNEL_OK")
</pallas_src>

<mosaic_0001>
module attributes {stable_mosaic.version = 11 : i64} {
  func.func @_hopf_copy_kernel(%arg0: memref<8x64xf32, #tpu.memory_space<any>>, %arg1: memref<8x64xf32, #tpu.memory_space<any>>, %arg2: memref<!tpu.dma_semaphore, #tpu.memory_space<semaphore_mem>>) attributes {dimension_semantics = [], scalar_prefetch = 0 : i64, scratch_operands = 1 : i64, tpu.core_type = #tpu.core_type<tc>} {
    tpu.enqueue_dma source(%arg0 : memref<8x64xf32, #tpu.memory_space<any>>) target(%arg1 : memref<8x64xf32, #tpu.memory_space<any>>) target_semaphore(%arg2 : memref<!tpu.dma_semaphore, #tpu.memory_space<semaphore_mem>>)
    tpu.wait_dma2 semaphore(%arg2 : memref<!tpu.dma_semaphore, #tpu.memory_space<semaphore_mem>>) src(%arg0 : memref<8x64xf32, #tpu.memory_space<any>>) dst(%arg1 : memref<8x64xf32, #tpu.memory_space<any>>)
    return
  }
}

</mosaic_0001>

<bundles_post_ra>
// kernel: tpu_custom_call.1
= control target key start
LH: loop header
LB: loop body
LE: loop exit
PB: predicated region body
PF: predicated region fallthrough
CT: control target
= control target key end

     0   :  { %s32_s12 = smov [#allocation2]   ;;  %s33_s13 = smov [#allocation3]   ;;  %s51_s0 = inlined_call_operand.hbm [shape: f32[8,64], index: 0, kind: input, shape index: {}]   ;;  %s52_s1 = inlined_call_operand.hbm [shape: f32[8,64], index: 1, kind: output, shape index: {}]  }
   0x1   :  { %s10_s8 = sshll.u32 %s51_s0, 4  ;;  %s12_s11 = sshll.u32 %s52_s1, 4  ;;  %s11_s8 = int_to_ptr.hbm [resolvable:$true] %s10_s8  ;;  %s13_s11 = int_to_ptr.hbm [resolvable:$true] %s12_s11 }
   0x2   :  { %s34_s14 = smov 0  }
   0x3   :  { %16 = dma.general %s11_s8, 128, %s13_s11, %s32_s12, %s33_s13, [#allocation4], %s34_s14, 0  }
   0x4   :  { %30 = dma.done.wait [#allocation2], 128 }
   0x5   :  { %31 = vsyncadd [#allocation2], 4294967168 }
   0x6   :  { %20 = vsyncmov [#allocation2] }
   0x9   :  { %s21_s15 = vpop.sfrf %20 }
   0xa   :  { %p26_p0 = scmp.ne.s32.totalorder %s21_s15, 0 }
   0xc   :  { %25 = shalt.err (%p26_p0)  }

</bundles_post_ra>
